<compile_context>
chip_gen: v7x
topology: tpu7x:2x2x1
jax: 0.10.0
libtpu: 0.0.40
codegen_flags: <defaults>
</compile_context>

<pallas_src>
import functools

import jax
import jax.numpy as jnp
from jax.experimental import pallas as pl
from jax.experimental.pallas import tpu as pltpu

LANE = 128


def _leaky_softplus_kernel(x_ref, o_ref, *, negative_slope, sharpness):
    x = x_ref[...].astype(jnp.float32)
    y = sharpness * x
    t = -jnp.abs(y)  # t <= 0, shared by both exponentials
    if negative_slope >= 0.0:
        # softplus(y) - softplus(-a*y)
        #   = [max(y,0) - max(-a*y,0)] + [log1p(exp(-|y|)) - log1p(exp(-a*|y|))]
        #   = leaky_relu(y)            +  log1p(exp(t))    - log1p(exp(a*t))
        lin = jnp.where(y >= 0.0, y, negative_slope * y)
        nl = jnp.log1p(jnp.exp(t)) - jnp.log1p(jnp.exp(negative_slope * t))
    else:
        # General fallback (negative_slope < 0): original stable two-softplus form.
        z = negative_slope * y
        lin = jnp.maximum(y, 0.0) - jnp.maximum(-z, 0.0)
        nl = jnp.log1p(jnp.exp(t)) - jnp.log1p(jnp.exp(-jnp.abs(z)))
    out = (lin + nl) * (1.0 / sharpness)
    o_ref[...] = out.astype(o_ref.dtype)


def _jnp_leaky_softplus(x, negative_slope, sharpness):
    """Plain-JAX path for the tiny (<128 elem) ragged tail."""
    xf = x.astype(jnp.float32)
    y = sharpness * xf
    out = -jax.nn.log_sigmoid(-y) + jax.nn.log_sigmoid(negative_slope * y)
    return (out / sharpness).astype(x.dtype)


def _run_pallas(x2d, negative_slope, sharpness, block_bytes):
    rows, _ = x2d.shape
    dtype = x2d.dtype
    itemsize = jnp.dtype(dtype).itemsize

    # Sublane alignment per dtype packing: 8 (f32), 16 (bf16/f16), 32 (int8/fp8).
    sub_mult = max(8, 32 // max(itemsize, 1))
    # Byte-budgeted block: ~block_bytes per block, rounded down to sub_mult rows.
    rows_per_block = max(sub_mult,
                         (block_bytes // (LANE * itemsize)) // sub_mult * sub_mult)
    # Shrink for small inputs so we don't DMA a mostly-padded block.
    rt = min(int(rows_per_block), pl.cdiv(rows, sub_mult) * sub_mult)
    grid = (pl.cdiv(rows, rt),)

    n = rows * LANE
    # Advisory cost estimate: ~10 flops + 4 transcendentals per element,
    # one read + one write of the tensor.
    cost = pl.CostEstimate(
        flops=10 * n,
        transcendentals=4 * n,
        bytes_accessed=2 * n * itemsize,
    )

    kernel = functools.partial(
        _leaky_softplus_kernel,
        negative_slope=float(negative_slope),
        sharpness=float(sharpness),
    )

    return pl.pallas_call(
        kernel,
        out_shape=jax.ShapeDtypeStruct((rows, LANE), dtype),
        grid_spec=pltpu.PrefetchScalarGridSpec(
            num_scalar_prefetch=0,
            grid=grid,
            in_specs=[pl.BlockSpec((rt, LANE), lambda i: (i, 0))],
            out_specs=pl.BlockSpec((rt, LANE), lambda i: (i, 0)),
        ),
        compiler_params=pltpu.CompilerParams(
            # "parallel" shards the single grid axis across TensorCores on v7x.
            # If xprof shows only one TC busy, switch to pltpu.CORE_PARALLEL.
            dimension_semantics=("parallel",),
            # 2x4 MiB input + 2x4 MiB output buffers = 16 MiB; 32 MiB scoped
            # limit works on every generation (v5e default is only 16 MiB).
            vmem_limit_bytes=32 * 1024 * 1024,
            # Let XLA fuse the wrapper reshape / upstream producers into the
            # custom call and save an HBM round-trip of x.
            allow_input_fusion=[True],
        ),
        cost_estimate=cost,
    )(x2d)


@functools.partial(jax.jit,
                   static_argnames=("negative_slope", "sharpness", "block_bytes"))
def leaky_softplus(x, negative_slope=0.01, sharpness=10.0, *,
                   block_bytes=4 * 1024 * 1024):
    """Elementwise LeakySoftPlus via Pallas. Works for any input shape/rank."""
    orig_shape = x.shape
    n = x.size
    if n == 0:
        return x

    flat = x.reshape(-1)
    n_main = (n // LANE) * LANE  # 128-aligned prefix handled by the kernel
    tail = n - n_main            # <=127 leftover elements handled in plain jnp

    main_out = None
    if n_main:
        x2d = flat[:n_main].reshape(n_main // LANE, LANE)
        main_out = _run_pallas(x2d, negative_slope, sharpness, block_bytes)
        main_out = main_out.reshape(-1)

    if tail:
        tail_out = _jnp_leaky_softplus(flat[n_main:], negative_slope, sharpness)
        out_flat = tail_out if main_out is None else jnp.concatenate(
            [main_out, tail_out])
    else:
        out_flat = main_out

    return out_flat.reshape(orig_shape)


def _reference(x, negative_slope=0.01, sharpness=10.0):
    # pure-JAX reference mirroring the torch code exactly
    y = sharpness * x
    out = -jax.nn.log_sigmoid(-y) + jax.nn.log_sigmoid(negative_slope * y)
    return out / sharpness


if __name__ == "__main__":
    key = jax.random.PRNGKey(0)
    # NCHW input, consistent with conv-style usage of the activation
    x = jax.random.normal(key, (2, 4, 16, 16), dtype=jnp.float32) * 3.0

    out = leaky_softplus(x, negative_slope=0.01, sharpness=10.0)
    out = jax.block_until_ready(out)

    ref = _reference(x, negative_slope=0.01, sharpness=10.0)
    assert out.shape == x.shape
    assert out.dtype == x.dtype
    assert jnp.max(jnp.abs(out - ref)) < 1e-5

    print("KERNEL_OK")
</pallas_src>

<mosaic_0001>
module attributes {stable_mosaic.version = 11 : i64} {
  func.func @_leaky_softplus_kernel(%arg0: i32, %arg1: memref<16x128xf32, #tpu.memory_space<vmem>>, %arg2: memref<16x128xf32, #tpu.memory_space<vmem>>) attributes {dimension_semantics = [#tpu.dimension_semantics<parallel>], iteration_bounds = array<i64: 1>, scalar_prefetch = 0 : i64, scratch_operands = 0 : i64, tpu.core_type = #tpu.core_type<tc>, window_params = [{transform_indices = @transform_0, window_bounds = array<i64: 16, 128>}, {transform_indices = @transform_1, window_bounds = array<i64: 16, 128>}]} {
    %c0 = arith.constant 0 : index
    %c0_0 = arith.constant 0 : index
    %0 = vector.load %arg1[%c0, %c0_0] : memref<16x128xf32, #tpu.memory_space<vmem>>, vector<16x128xf32>
    %cst = arith.constant 1.000000e+01 : f32
    %1 = vector.broadcast %cst : f32 to vector<16x128xf32>
    %2 = arith.mulf %1, %0 : vector<16x128xf32>
    %3 = math.absf %2 : vector<16x128xf32>
    %cst_1 = arith.constant 0.000000e+00 : f32
    %4 = vector.broadcast %cst_1 : f32 to vector<16x128xf32>
    %5 = arith.subf %4, %3 : vector<16x128xf32>
    %cst_2 = arith.constant 0.000000e+00 : f32
    %6 = vector.broadcast %cst_2 : f32 to vector<16x128xf32>
    %7 = arith.cmpf oge, %2, %6 : vector<16x128xf32>
    %cst_3 = arith.constant 0.00999999977 : f32
    %8 = vector.broadcast %cst_3 : f32 to vector<16x128xf32>
    %9 = arith.mulf %8, %2 : vector<16x128xf32>
    %10 = arith.select %7, %2, %9 : vector<16x128xi1>, vector<16x128xf32>
    %11 = math.exp %5 : vector<16x128xf32>
    %12 = math.log1p %11 : vector<16x128xf32>
    %cst_4 = arith.constant 0.00999999977 : f32
    %13 = vector.broadcast %cst_4 : f32 to vector<16x128xf32>
    %14 = arith.mulf %13, %5 : vector<16x128xf32>
    %15 = math.exp %14 : vector<16x128xf32>
    %16 = math.log1p %15 : vector<16x128xf32>
    %17 = arith.subf %12, %16 : vector<16x128xf32>
    %18 = arith.addf %10, %17 : vector<16x128xf32>
    %cst_5 = arith.constant 1.000000e-01 : f32
    %19 = vector.broadcast %cst_5 : f32 to vector<16x128xf32>
    %20 = arith.mulf %18, %19 : vector<16x128xf32>
    %c0_6 = arith.constant 0 : index
    %c0_7 = arith.constant 0 : index
    %21 = vector.load %arg2[%c0_6, %c0_7] : memref<16x128xf32, #tpu.memory_space<vmem>>, vector<16x128xf32>
    tpu.vector_store %arg2[%c0_6, %c0_7], %20 {strides = array<i32>} : memref<16x128xf32, #tpu.memory_space<vmem>>, vector<16x128xf32>,
    return
  }
  func.func @transform_0(%arg0: i32) -> (i32, i32) {
    %c0_i32 = arith.constant 0 : i32
    %c0_i32_0 = arith.constant 0 : i32
    return %arg0, %c0_i32 : i32, i32
  }
  func.func @transform_1(%arg0: i32) -> (i32, i32) {
    %c0_i32 = arith.constant 0 : i32
    %c0_i32_0 = arith.constant 0 : i32
    return %arg0, %c0_i32 : i32, i32
  }
}

</mosaic_0001>

<bundles_post_ra>
// kernel: leaky_softplus.1
= control target key start
LH: loop header
LB: loop body
LE: loop exit
PB: predicated region body
PF: predicated region fallthrough
CT: control target
= control target key end

     0   :  { %s137_s0 = inlined_call_operand.vmem [shape: f32[16,128], index: 0, kind: input, shape index: {}]   ;;  %s138_s1 = inlined_call_operand.vmem [shape: f32[16,128], index: 1, kind: output, shape index: {}]  }
   0x1   :  { %v8_v0 = vld [vmem:[%s137_s0] sm:$0xff]  ;;  %v9_v1 = vld [vmem:[%s137_s0 + $0x8] sm:$0xff] }
   0x2   :  { %v10_v2 = vmul.f32 10.0, %v8_v0  ;;  %v112_v3 = vmul.f32 10.0, %v9_v1 }
   0x4   :  { %v12_v4 = vand.u32 2147483647, %v10_v2  ;;  %v13_v5 = vand.u32 2147483647, %v112_v3  ;;  %vm16_vm0 = vcmp.ge.f32.partialorder %v10_v2, 0.0  ;;  %vm17_vm4 = vcmp.ge.f32.partialorder %v112_v3, 0.0 }
   0x5   :  { %v18_v38 = vmul.f32 0.01, %v10_v2  ;;  %v19_v47 = vmul.f32 0.01, %v112_v3 }
   0x6   :  { %v14_v6 = vsub.f32 0.0, %v12_v4  ;;  %v15_v7 = vsub.f32 0.0, %v13_v5 }
   0x7   :  { %v20_v50 = vsel %vm16_vm0, %v10_v2, %v18_v38  ;;  %v21_v55 = vsel %vm17_vm4, %v112_v3, %v19_v47 }
   0x8   :  { %v22_v8 = vmul.f32 1.442695, %v14_v6  ;;  %v44_v9 = vmul.f32 0.01, %v14_v6  ;;  %v24_v10 = vmul.f32 1.442695, %v15_v7 }
   0x9   :  { %v45_v11 = vmul.f32 0.01, %v15_v7 }
   0xa   :  { %80 = vpow2.f32 %v22_v8  ;;  %v46_v12 = vmul.f32 1.442695, %v44_v9 }
   0xb   :  { %82 = vpow2.f32 %v24_v10  ;;  %v48_v13 = vmul.f32 1.442695, %v45_v11 }
   0xc   :  { %84 = vpow2.f32 %v46_v12 }
   0xd   :  { %86 = vpow2.f32 %v48_v13 }
  0x14   :  { %v81_v14 = vpop.eup %80 }
  0x15   :  { %v83_v15 = vpop.eup %82  ;;  %v26_v16 = vadd.f32 1.0, %v81_v14  ;;  %v29_v21 = vmul.f32 -0.5, %v81_v14  ;;  %v32_v27 = vand.u32 2147483647, %v81_v14 }
  0x16   :  { %v85_v17 = vpop.eup %84  ;;  %v35_v18 = vadd.f32 1.0, %v83_v15  ;;  %v38_v24 = vmul.f32 -0.5, %v83_v15  ;;  %v41_v31 = vand.u32 2147483647, %v83_v15 }
  0x17   :  { %v87_v19 = vpop.eup %86  ;;  %88 = vlog2.f32 %v26_v16  ;;  %v50_v20 = vadd.f32 1.0, %v85_v17  ;;  %v53_v23 = vmul.f32 -0.5, %v85_v17  ;;  %v30_v25 = vadd.f32 1.0, %v29_v21 }
  0x18   :  { %90 = vlog2.f32 %v35_v18  ;;  %v59_v22 = vadd.f32 1.0, %v87_v19  ;;  %v62_v26 = vmul.f32 -0.5, %v87_v19  ;;  %v39_v29 = vadd.f32 1.0, %v38_v24 }
  0x19   :  { %92 = vlog2.f32 %v50_v20  ;;  %v54_v28 = vadd.f32 1.0, %v53_v23  ;;  %v56_v30 = vand.u32 2147483647, %v85_v17  ;;  %v31_v32 = vmul.f32 %v81_v14, %v30_v25 }
  0x1a   :  { %94 = vlog2.f32 %v59_v22  ;;  %v63_v33 = vadd.f32 1.0, %v62_v26  ;;  %vm115_vm1 = vcmp.lt.f32.partialorder %v32_v27, 0.0004427343  ;;  %v65_v36 = vand.u32 2147483647, %v87_v19 }
  0x1b   :  { %v55_v40 = vmul.f32 %v85_v17, %v54_v28  ;;  %v40_v41 = vmul.f32 %v83_v15, %v39_v29  ;;  %vm57_vm2 = vcmp.lt.f32.partialorder %v56_v30, 0.0004427343  ;;  %vm119_vm3 = vcmp.lt.f32.partialorder %v41_v31, 0.0004427343 }
  0x1c   :  { %v64_v48 = vmul.f32 %v87_v19, %v63_v33  ;;  %vm66_vm5 = vcmp.lt.f32.partialorder %v65_v36, 0.0004427343 }
  0x21   :  { %v89_v34 = vpop.eup %88 }
  0x22   :  { %v91_v37 = vpop.eup %90  ;;  %v28_v39 = vmul.f32 0.6931472, %v89_v34 }
  0x23   :  { %v93_v42 = vpop.eup %92  ;;  %v37_v43 = vmul.f32 0.6931472, %v91_v37 }
  0x24   :  { %v34_v45 = vsel %vm115_vm1, %v31_v32, %v28_v39  ;;  %v52_v46 = vmul.f32 0.6931472, %v93_v42  ;;  %v95_v49 = vpop.eup %94 }
  0x25   :  { %v43_v52 = vsel %vm119_vm3, %v40_v41, %v37_v43  ;;  %v61_v53 = vmul.f32 0.6931472, %v95_v49 }
  0x26   :  { %v58_v51 = vsel %vm57_vm2, %v55_v40, %v52_v46 }
  0x27   :  { %v68_v54 = vsub.f32 %v34_v45, %v58_v51  ;;  %v67_v56 = vsel %vm66_vm5, %v64_v48, %v61_v53 }
  0x28   :  { %v69_v58 = vsub.f32 %v43_v52, %v67_v56 }
  0x29   :  { %v70_v57 = vadd.f32 %v68_v54, %v20_v50 }
  0x2a   :  { %v71_v60 = vadd.f32 %v69_v58, %v21_v55 }
  0x2b   :  { %v72_v59 = vmul.f32 0.1, %v70_v57 }
  0x2c   :  { %v73_v61 = vmul.f32 0.1, %v71_v60 }
  0x2d   :  { %74 = vst [vmem:[%s138_s1] sm:$0xff] %v72_v59 }
  0x2e   :  { %75 = vst [vmem:[%s138_s1 + $0x8] sm:$0xff] %v73_v61 }

</bundles_post_ra>
